<compile_context>
chip_gen: v7x
topology: tpu7x:2x2x1
jax: 0.10.0
libtpu: 0.0.40
codegen_flags: <defaults>
</compile_context>

<pallas_src>
import functools
import math

import jax
import jax.numpy as jnp
import numpy as np
from jax.experimental import pallas as pl
from jax.experimental.pallas import tpu as pltpu


def gat_kernel(x_ref, waug_ref, wa1_ref, out_ref, f1_scr, acc_scr, *,
               tile_n, out_features, alpha, concat):
    """One (head, column-tile) grid step.

    x_ref    : (N, F_in)        full node features (resident, fetched once)
    waug_ref : (F_in, F_out+1)  [W | W @ a2]  for this head
    wa1_ref  : (F_in, 1)        W @ a1        for this head
    out_ref  : (N, F_out)       output block for this head
    f1_scr   : (N, 1)   f32     f1[i] = h[i]·a1  (per-head, computed at j==0)
    acc_scr  : (N, F_out) f32   running sum over column tiles of attn @ h
    """
    j = pl.program_id(1)

    @pl.when(j == 0)
    def _init():
        # f1 = x @ (W @ a1) == (x @ W) @ a1 — folded onto the MXU, once per head.
        f1_scr[...] = jnp.dot(x_ref[...], wa1_ref[...],
                              preferred_element_type=jnp.float32)
        acc_scr[...] = jnp.zeros_like(acc_scr)

    start = pl.multiple_of(j * tile_n, tile_n)
    x_tile = x_ref[pl.ds(start, tile_n), :]                       # (tj, F_in)

    # One MXU pass yields both this tile's h rows and its f2 scores:
    #   x_tile @ [W | W@a2] = [h_tile | f2_tile]
    haug = jnp.dot(x_tile, waug_ref[...],
                   preferred_element_type=jnp.float32)            # (tj, F_out+1)
    h_tile = haug[:, :out_features]                               # (tj, F_out)
    f2_row = jnp.transpose(haug[:, out_features:])                # (1, tj), tiny XLU op

    # e[i, jj] = LeakyReLU(f1[i] + f2[jj]) — rank-1 logits, (N, tile) at a time.
    e = f1_scr[...] + f2_row
    e = jnp.where(e > 0.0, e, alpha * e)

    # softmax over dim=0 (per column): every column of this tile is complete,
    # so the per-tile column softmax is exact — no online rescaling needed.
    e_max = jnp.max(e, axis=0, keepdims=True)
    p = jnp.exp(e - e_max)
    # The normalizer is only a (1, tile) vector, so the exact reciprocal is
    # essentially free; it preserves tight parity with the f32 reference.
    # (Flip to approx=True for the EUP vrcp path if looser tolerance is OK.)
    attn = p * pl.reciprocal(jnp.sum(p, axis=0, keepdims=True), approx=False)

    # h_prime accumulation over column tiles (MXU, f32 accumulate).
    acc_scr[...] += jnp.dot(attn, h_tile, preferred_element_type=jnp.float32)

    @pl.when(j == pl.num_programs(1) - 1)
    def _finalize():
        hp = acc_scr[...]
        if concat:
            hp = jnp.where(hp > 0.0, hp, jnp.exp(hp) - 1.0)       # ELU, alpha=1
        out_ref[...] = hp.astype(out_ref.dtype)


def _pick_tile(n, max_tile=512):
    """Column-tile size for e: prefer lane-aligned (128x) divisors of N."""
    if n <= max_tile:
        return n
    for t in range(max_tile, 127, -128):      # 512, 384, 256, 128
        if n % t == 0:
            return t
    for t in range(max_tile, 7, -8):          # sublane-aligned fallback
        if n % t == 0:
            return t
    return n  # TODO(synk): masked tail tile for ragged / prime N


def gat_forward(x, adj, W, a, *, alpha, concat=True, tile_n=None):
    """GAT forward.

    x: (N, F_in); adj: (N, N) (unused, mirrors the reference's dead code);
    W: (F_in, F_out) or (H, F_in, F_out); a: (2*F_out, 1) or (H, 2*F_out, 1).
    Returns (N, F_out) for a single head, (H, N, F_out) for stacked heads.
    """
    # The reference never applies the adjacency mask, so we do NOT ship it to
    # the kernel at all: saves the N*N HBM read + double-buffered VMEM.
    del adj

    x = jnp.asarray(x)
    W = jnp.asarray(W)
    a = jnp.asarray(a)
    single_head = (W.ndim == 2)
    if single_head:
        W = W[None]
        a = a[None]
    H, f_in, f_out = W.shape
    N = x.shape[0]

    # Fold the attention-vector projections into MXU matmuls (tiny wrapper-side
    # precompute of (F_in, F_out+1) / (F_in, 1) weight slabs).
    a1 = a[:, :f_out, :]                                   # (H, F_out, 1)
    a2 = a[:, f_out:, :]                                   # (H, F_out, 1)
    wa1 = jnp.matmul(W, a1)                                # (H, F_in, 1)
    waug = jnp.concatenate([W, jnp.matmul(W, a2)], -1)     # (H, F_in, F_out+1)

    if tile_n is None:
        tile_n = _pick_tile(N)
    assert N % tile_n == 0, "tile_n must divide N"
    n_j = N // tile_n

    kernel = functools.partial(
        gat_kernel, tile_n=tile_n, out_features=f_out,
        alpha=float(alpha), concat=bool(concat))

    flops = 2 * H * N * f_in * (f_out + 2) + 2 * H * N * N * f_out
    transcendentals = H * N * N + (H * N * f_out if concat else 0)
    bytes_accessed = 4 * (N * f_in + H * f_in * (f_out + 2) + H * N * f_out)

    out = pl.pallas_call(
        kernel,
        out_shape=jax.ShapeDtypeStruct((H, N, f_out), x.dtype),
        grid_spec=pltpu.PrefetchScalarGridSpec(
            num_scalar_prefetch=0,
            grid=(H, n_j),                                 # (heads, column tiles)
            in_specs=[
                # x is shared by all grid steps -> fetched once, stays resident.
                pl.BlockSpec((N, f_in), lambda h, j: (0, 0)),
                # Per-head weight slabs (leading head dim squeezed away).
                pl.BlockSpec((None, f_in, f_out + 1), lambda h, j: (h, 0, 0)),
                pl.BlockSpec((None, f_in, 1), lambda h, j: (h, 0, 0)),
            ],
            out_specs=pl.BlockSpec((None, N, f_out), lambda h, j: (h, 0, 0)),
            scratch_shapes=[
                pltpu.VMEM((N, 1), jnp.float32),           # f1 (per head)
                pltpu.VMEM((N, f_out), jnp.float32),       # h_prime accumulator
            ],
        ),
        compiler_params=pltpu.CompilerParams(
            # head axis shards across TensorCores (v7x megacore); the column
            # tile axis carries the accumulator -> "arbitrary".
            dimension_semantics=("parallel", "arbitrary"),
            # Budget against the v7x 64 MiB / 32 MiB-scoped VMEM, with headroom.
            vmem_limit_bytes=32 * 1024 * 1024,
        ),
        cost_estimate=pl.CostEstimate(
            flops=int(flops),
            transcendentals=int(transcendentals),
            bytes_accessed=int(bytes_accessed),
        ),
    )(x, waug, wa1)

    return out[0] if single_head else out


def xavier_uniform(key, shape, gain):
    # Matches torch.nn.init.xavier_uniform_ for 2-D tensors.
    fan_out, fan_in = shape[0], shape[1]
    bound = gain * math.sqrt(6.0 / (fan_in + fan_out))
    return jax.random.uniform(key, shape, jnp.float32, -bound, bound)


def gat_ref(x, adj, W, a, *, alpha, concat=True):
    """Pure-JAX reference mirroring the PyTorch forward."""
    del adj  # unused in the reference module's compute path
    h = x @ W
    f_out = W.shape[1]
    f1 = h @ a[:f_out, :]
    f2 = h @ a[f_out:, :]
    e = f1 + f2.T
    e = jnp.where(e > 0, e, alpha * e)
    attn = jax.nn.softmax(e, axis=0)
    hp = attn @ h
    return jax.nn.elu(hp) if concat else hp


if __name__ == "__main__":
    N = 8                 # number of graph nodes
    in_features = 16
    out_features = 32
    alpha = 0.2
    concat = True

    key = jax.random.PRNGKey(0)
    kx, kadj, kw, ka = jax.random.split(key, 4)

    x = jax.random.normal(kx, (N, in_features), jnp.float32)
    adj = (jax.random.uniform(kadj, (N, N)) > 0.5).astype(jnp.float32)
    W = xavier_uniform(kw, (in_features, out_features), gain=1.414)
    a = xavier_uniform(ka, (2 * out_features, 1), gain=1.414)

    # Single head: exact module semantics.
    out = jax.block_until_ready(gat_forward(x, adj, W, a, alpha=alpha, concat=concat))
    ref = gat_ref(x, adj, W, a, alpha=alpha, concat=concat)
    # Tolerance allows for the reassociated a-projection (x @ (W a) vs (x W) a).
    np.testing.assert_allclose(np.asarray(out), np.asarray(ref), rtol=5e-5, atol=5e-5)

    # Head-batched path: 4 heads in one pallas_call (parallel grid axis).
    H = 4
    kW = jax.random.split(jax.random.PRNGKey(1), H)
    kA = jax.random.split(jax.random.PRNGKey(2), H)
    Wh = jnp.stack([xavier_uniform(k, (in_features, out_features), 1.414) for k in kW])
    ah = jnp.stack([xavier_uniform(k, (2 * out_features, 1), 1.414) for k in kA])
    out_h = jax.block_until_ready(gat_forward(x, adj, Wh, ah, alpha=alpha, concat=concat))
    ref_h = jnp.stack([gat_ref(x, adj, Wh[i], ah[i], alpha=alpha, concat=concat)
                       for i in range(H)])
    np.testing.assert_allclose(np.asarray(out_h), np.asarray(ref_h), rtol=5e-5, atol=5e-5)

    print("KERNEL_OK")
</pallas_src>

<mosaic_0001>
module attributes {stable_mosaic.version = 11 : i64} {
  func.func @gat_kernel(%arg0: i32, %arg1: i32, %arg2: memref<8x16xf32, #tpu.memory_space<vmem>>, %arg3: memref<1x16x33xf32, #tpu.memory_space<vmem>>, %arg4: memref<1x16x1xf32, #tpu.memory_space<vmem>>, %arg5: memref<1x8x32xf32, #tpu.memory_space<vmem>>, %arg6: memref<8x1xf32, #tpu.memory_space<vmem>>, %arg7: memref<8x32xf32, #tpu.memory_space<vmem>>) attributes {dimension_semantics = [#tpu.dimension_semantics<parallel>, #tpu.dimension_semantics<arbitrary>], iteration_bounds = array<i64: 1, 1>, scalar_prefetch = 0 : i64, scratch_operands = 2 : i64, tpu.core_type = #tpu.core_type<tc>, window_params = [{pipeline_mode = #tpu.pipeline_mode<synchronous>, transform_indices = @transform_0, window_bounds = array<i64: 8, 16>}, {transform_indices = @transform_1, window_bounds = array<i64: 1, 16, 33>}, {transform_indices = @transform_2, window_bounds = array<i64: 1, 16, 1>}, {transform_indices = @transform_3, window_bounds = array<i64: 1, 8, 32>}]} {
    %c0_i32 = arith.constant 0 : i32
    %0 = arith.cmpi eq, %arg1, %c0_i32 : i32
    %1 = arith.extui %0 : i1 to i32
    %c0_i32_0 = arith.constant 0 : i32
    %2 = arith.cmpi ne, %1, %c0_i32_0 : i32
    scf.if %2 {
      %c0_17 = arith.constant 0 : index
      %c0_18 = arith.constant 0 : index
      %39 = vector.load %arg2[%c0_17, %c0_18] : memref<8x16xf32, #tpu.memory_space<vmem>>, vector<8x16xf32>
      %c0_19 = arith.constant 0 : index
      %c0_20 = arith.constant 0 : index
      %c0_21 = arith.constant 0 : index
      %40 = vector.load %arg4[%c0_19, %c0_20, %c0_21] : memref<1x16x1xf32, #tpu.memory_space<vmem>>, vector<1x16x1xf32>
      %41 = vector.shape_cast %40 : vector<1x16x1xf32> to vector<16x1xf32>
      %cst_22 = arith.constant dense<0.000000e+00> : vector<8x1xf32>
      %42 = tpu.matmul %39, %41, %cst_22 {dimension_numbers = #tpu.dot_dimension_numbers<[1], [0], [0], [1], [0, 0, 1, 1], [], []>} : vector<8x16xf32>, vector<16x1xf32>, vector<8x1xf32> -> vector<8x1xf32>
      %c0_23 = arith.constant 0 : index
      %c0_24 = arith.constant 0 : index
      %43 = vector.load %arg6[%c0_23, %c0_24] : memref<8x1xf32, #tpu.memory_space<vmem>>, vector<8x1xf32>
      tpu.vector_store %arg6[%c0_23, %c0_24], %42 {strides = array<i32>} : memref<8x1xf32, #tpu.memory_space<vmem>>, vector<8x1xf32>,
      %cst_25 = arith.constant 0.000000e+00 : f32
      %44 = vector.broadcast %cst_25 : f32 to vector<8x32xf32>
      %c0_26 = arith.constant 0 : index
      %c0_27 = arith.constant 0 : index
      %45 = vector.load %arg7[%c0_26, %c0_27] : memref<8x32xf32, #tpu.memory_space<vmem>>, vector<8x32xf32>
      tpu.vector_store %arg7[%c0_26, %c0_27], %44 {strides = array<i32>} : memref<8x32xf32, #tpu.memory_space<vmem>>, vector<8x32xf32>,
    } else {
    }
    %c8_i32 = arith.constant 8 : i32
    %3 = arith.muli %arg1, %c8_i32 : i32
    %4 = tpu.assume_multiple %3, 8 : i32
    %5 = arith.index_cast %4 : i32 to index
    %c0 = arith.constant 0 : index
    %6 = vector.load %arg2[%5, %c0] : memref<8x16xf32, #tpu.memory_space<vmem>>, vector<8x16xf32>
    %c0_1 = arith.constant 0 : index
    %c0_2 = arith.constant 0 : index
    %c0_3 = arith.constant 0 : index
    %7 = vector.load %arg3[%c0_1, %c0_2, %c0_3] : memref<1x16x33xf32, #tpu.memory_space<vmem>>, vector<1x16x33xf32>
    %8 = vector.shape_cast %7 : vector<1x16x33xf32> to vector<16x33xf32>
    %cst = arith.constant dense<0.000000e+00> : vector<8x33xf32>
    %9 = tpu.matmul %6, %8, %cst {dimension_numbers = #tpu.dot_dimension_numbers<[1], [0], [0], [1], [0, 0, 1, 1], [], []>} : vector<8x16xf32>, vector<16x33xf32>, vector<8x33xf32> -> vector<8x33xf32>
    %10 = vector.extract_strided_slice %9 {offsets = [0, 0], sizes = [8, 32], strides = [1, 1]} : vector<8x33xf32> to vector<8x32xf32>
    %11 = vector.extract_strided_slice %9 {offsets = [0, 32], sizes = [8, 1], strides = [1, 1]} : vector<8x33xf32> to vector<8x1xf32>
    %12 = tpu.transpose %11, [1, 0] : vector<8x1xf32> -> vector<1x8xf32>
    %c0_4 = arith.constant 0 : index
    %c0_5 = arith.constant 0 : index
    %13 = vector.load %arg6[%c0_4, %c0_5] : memref<8x1xf32, #tpu.memory_space<vmem>>, vector<8x1xf32>
    %14 = vector.broadcast %13 : vector<8x1xf32> to vector<8x8xf32>
    %15 = vector.broadcast %12 : vector<1x8xf32> to vector<8x8xf32>
    %16 = arith.addf %14, %15 : vector<8x8xf32>
    %cst_6 = arith.constant 0.000000e+00 : f32
    %17 = vector.broadcast %cst_6 : f32 to vector<8x8xf32>
    %18 = arith.cmpf ogt, %16, %17 : vector<8x8xf32>
    %cst_7 = arith.constant 2.000000e-01 : f32
    %19 = vector.broadcast %cst_7 : f32 to vector<8x8xf32>
    %20 = arith.mulf %19, %16 : vector<8x8xf32>
    %21 = arith.select %18, %16, %20 : vector<8x8xi1>, vector<8x8xf32>
    %cst_8 = arith.constant dense<0xFF800000> : vector<8xf32>
    %22 = vector.multi_reduction <maximumf>, %21, %cst_8 [0] : vector<8x8xf32> to vector<8xf32>
    %23 = vector.shape_cast %22 : vector<8xf32> to vector<1x8xf32>
    %24 = vector.broadcast %23 : vector<1x8xf32> to vector<8x8xf32>
    %25 = arith.subf %21, %24 : vector<8x8xf32>
    %26 = math.exp %25 : vector<8x8xf32>
    %cst_9 = arith.constant dense<0.000000e+00> : vector<8xf32>
    %27 = vector.multi_reduction <add>, %26, %cst_9 [0] : vector<8x8xf32> to vector<8xf32>
    %28 = vector.shape_cast %27 : vector<8xf32> to vector<1x8xf32>
    %29 = tpu.reciprocal %28 : vector<1x8xf32> -> vector<1x8xf32>
    %30 = vector.broadcast %29 : vector<1x8xf32> to vector<8x8xf32>
    %31 = arith.mulf %26, %30 : vector<8x8xf32>
    %c0_10 = arith.constant 0 : index
    %c0_11 = arith.constant 0 : index
    %32 = vector.load %arg7[%c0_10, %c0_11] : memref<8x32xf32, #tpu.memory_space<vmem>>, vector<8x32xf32>
    %cst_12 = arith.constant dense<0.000000e+00> : vector<8x32xf32>
    %33 = tpu.matmul %31, %10, %cst_12 {dimension_numbers = #tpu.dot_dimension_numbers<[1], [0], [0], [1], [0, 0, 1, 1], [], []>} : vector<8x8xf32>, vector<8x32xf32>, vector<8x32xf32> -> vector<8x32xf32>
    %34 = arith.addf %32, %33 : vector<8x32xf32>
    %c0_13 = arith.constant 0 : index
    %c0_14 = arith.constant 0 : index
    %35 = vector.load %arg7[%c0_13, %c0_14] : memref<8x32xf32, #tpu.memory_space<vmem>>, vector<8x32xf32>
    tpu.vector_store %arg7[%c0_13, %c0_14], %34 {strides = array<i32>} : memref<8x32xf32, #tpu.memory_space<vmem>>, vector<8x32xf32>,
    %c0_i32_15 = arith.constant 0 : i32
    %36 = arith.cmpi eq, %arg1, %c0_i32_15 : i32
    %37 = arith.extui %36 : i1 to i32
    %c0_i32_16 = arith.constant 0 : i32
    %38 = arith.cmpi ne, %37, %c0_i32_16 : i32
    scf.if %38 {
      %c0_17 = arith.constant 0 : index
      %c0_18 = arith.constant 0 : index
      %39 = vector.load %arg7[%c0_17, %c0_18] : memref<8x32xf32, #tpu.memory_space<vmem>>, vector<8x32xf32>
      %cst_19 = arith.constant 0.000000e+00 : f32
      %40 = vector.broadcast %cst_19 : f32 to vector<8x32xf32>
      %41 = arith.cmpf ogt, %39, %40 : vector<8x32xf32>
      %42 = math.exp %39 : vector<8x32xf32>
      %cst_20 = arith.constant 1.000000e+00 : f32
      %43 = vector.broadcast %cst_20 : f32 to vector<8x32xf32>
      %44 = arith.subf %42, %43 : vector<8x32xf32>
      %45 = arith.select %41, %39, %44 : vector<8x32xi1>, vector<8x32xf32>
      %c0_21 = arith.constant 0 : index
      %c0_22 = arith.constant 0 : index
      %c0_23 = arith.constant 0 : index
      %46 = vector.load %arg5[%c0_21, %c0_22, %c0_23] : memref<1x8x32xf32, #tpu.memory_space<vmem>>, vector<1x8x32xf32>
      %47 = vector.shape_cast %46 : vector<1x8x32xf32> to vector<8x32xf32>
      %48 = vector.shape_cast %45 : vector<8x32xf32> to vector<1x8x32xf32>
      tpu.vector_store %arg5[%c0_21, %c0_22, %c0_23], %48 {strides = array<i32>} : memref<1x8x32xf32, #tpu.memory_space<vmem>>, vector<1x8x32xf32>,
    } else {
    }
    return
  }
  func.func @transform_0(%arg0: i32, %arg1: i32) -> (i32, i32) {
    %c0_i32 = arith.constant 0 : i32
    %c0_i32_0 = arith.constant 0 : i32
    %c0_i32_1 = arith.constant 0 : i32
    return %c0_i32, %c0_i32_0 : i32, i32
  }
  func.func @transform_1(%arg0: i32, %arg1: i32) -> (i32, i32, i32) {
    %c0_i32 = arith.constant 0 : i32
    %c0_i32_0 = arith.constant 0 : i32
    %c0_i32_1 = arith.constant 0 : i32
    return %arg0, %c0_i32, %c0_i32_0 : i32, i32, i32
  }
  func.func @transform_2(%arg0: i32, %arg1: i32) -> (i32, i32, i32) {
    %c0_i32 = arith.constant 0 : i32
    %c0_i32_0 = arith.constant 0 : i32
    %c0_i32_1 = arith.constant 0 : i32
    return %arg0, %c0_i32, %c0_i32_0 : i32, i32, i32
  }
  func.func @transform_3(%arg0: i32, %arg1: i32) -> (i32, i32, i32) {
    %c0_i32 = arith.constant 0 : i32
    %c0_i32_0 = arith.constant 0 : i32
    %c0_i32_1 = arith.constant 0 : i32
    return %arg0, %c0_i32, %c0_i32_0 : i32, i32, i32
  }
}

</mosaic_0001>

<bundles_post_ra>
// kernel: tpu_custom_call.1
= control target key start
LH: loop header
LB: loop body
LE: loop exit
PB: predicated region body
PF: predicated region fallthrough
CT: control target
= control target key end

     0   :  { %8 = vsyncpa [#allocation5], 0  ;;  %s534_s0 = inlined_call_operand.hbm [shape: f32[8,16], index: 0, kind: input, shape index: {}]   ;;  %s535_s1 = inlined_call_operand.vmem [shape: f32[1,16,33], index: 1, kind: input, shape index: {}]   ;;  %s536_s2 = inlined_call_operand.vmem [shape: f32[1,16,1], index: 2, kind: input, shape index: {}]   ;;  %s537_s3 = inlined_call_operand.hbm [shape: f32[1,8,32], index: 3, kind: output, shape index: {}]  }
   0x1   :  { %9 = vsyncpa [#allocation6], 0  ;;  %s462_s12 = smov [#allocation4]   ;;  %s414_s16 = scalar_lea.hbm %s534_s0, 128 }
   0x2   :  { %s16_s13 = sshll.u32 %s462_s12, 4  ;;  %p415_p0 = scmp.ne.s32.totalorder %s534_s0, %s414_s16  ;;  %s17_s13 = int_to_ptr.vmem [resolvable:$true] %s16_s13 }
   0x3   :  { %p418_p1 = scmp.lt.u32.totalorder %s414_s16, %s534_s0 }
   0x5   :  { %p420_p2 = pnand %p418_p1, %p415_p0 }
   0x7   :  { %423 = shalt.err (!%p420_p2)
}
   0x8   :  { %s424_s21 = scalar_lea.vmem %s17_s13, 128  ;;  %p429_p4 = scmp.lt.s32.totalorder %s17_s13, %s17_s13 }
   0x9   :  { %p425_p3 = scmp.ne.s32.totalorder %s17_s13, %s424_s21  ;;  %p430_p5 = scmp.lt.s32.totalorder %s424_s21, %s424_s21 }
   0xb   :  { %p431_p6 = por %p430_p5, %p429_p4 }
   0xd   :  { %p432_p7 = pnand %p431_p6, %p425_p3 }
   0xf   :  { %435 = shalt.err (!%p432_p7)
}
  0x10   :  { %19 = dma.hbm_to_vmem [thread:$0]  %s534_s0, 128, %s17_s13, [#allocation5]  }
  0x11   :  { %458 = dma.done.wait [#allocation5], 128  }
  0x12   :  { %459 = vsyncadd [#allocation5], 4294967168  ;;  %v463_v0 = vmov 0.0|0.0   ;;  %vm464_vm0 = vmmov 0   ;;  %v465_v1 = vmov 0.0   ;;  %v115_v2 = vld [vmem:[%s535_s1] sm:$0xff]  ;;  %v233_v16 = vlaneseq }
  0x13   :  { %397 = vmatprep.subr.bf16.mxu1 %v463_v0  ;;  %386 = vmatprep.mubr.msk.f32.mxu1 %vm464_vm0, %v465_v1  ;;  %v116_v3 = vld [vmem:[%s535_s1 + $0x8] sm:$0xff]  ;;  %v32_v5 = vld [vmem:[%s536_s2] sm:$0xff]  ;;  %vm34_vm1 = vcmask 130048   ;;  %v114_v8 = vld [vmem:[#allocation4] sm:$0xff]  ;;  %v466_v9 = vmov 0   ;;  %vm108_vm2 = vcmask 7168  }
  0x14   :  { %394 = vmatprep.subr.bf16.mxu0 %v463_v0  ;;  %379 = vmatprep.mubr.msk.f32.mxu0 %vm464_vm0, %v465_v1  ;;  %v398_v4 = vpack.c.bf16 %v116_v3, %v115_v2  ;;  %v33_v6 = vld [vmem:[%s536_s2 + $0x8] sm:$0xff]  ;;  %s467_s1 = smov 96   ;;  %vm110_vm3 = vcmask 261120   ;;  %v234_v17 = vshrl.u32 %v233_v16, 7  ;;  %vm241_vm5 = vcmask 64512   ;;  %s468_s2 = smov [#allocation7]  }
  0x15   :  { %v395_v7 = vpack.c.bf16 %v33_v6, %v32_v5  ;;  %407 = vset.pattern.permute.xlu0 %v466_v9  ;;  %111 = vst.msk [vmem:[#allocation3] sm:$0xff] %vm110_vm3, %v465_v1  ;;  %s354_s4 = sshll.u32 %s468_s2, 4  ;;  %s355_s4 = int_to_ptr.vmem [resolvable:$true] %s354_s4 }
  0x16   :  { %399 = vmatpush3.bf16.msra.mxu1 %v398_v4  ;;  %v235_v18 = vsub.s32 0, %v234_v17  ;;  %s436_s5 = scalar_lea.vmem %s355_s4, 128  ;;  %p441_p9 = scmp.lt.s32.totalorder %s355_s4, %s355_s4 }
  0x17   :  { %396 = vmatpush3.bf16.msra.mxu0 %v395_v7  ;;  %p437_p8 = scmp.ne.s32.totalorder %s355_s4, %s436_s5  ;;  %p442_p10 = scmp.lt.s32.totalorder %s436_s5, %s436_s5 }
  0x18   :  { %389 = vmatprep.subr.mxu0 %v465_v1 }
  0x19   :  { %387 = vmatmul.mubr.msk.f32.vlgmr.msra.gmra.mrb[0].mxu1 %vm34_vm1, %v114_v8  ;;  %p443_p11 = por %p442_p10, %p441_p9 }
  0x1a   :  { %380 = vmatmul.mubr.msk.f32.vlgmr.msra.gmra.mrb[0].mxu0 %vm34_vm1, %v114_v8 }
  0x1b   :  { %391 = vmatprep.mubr.msk.f32.mxu0 %vm464_vm0, %v465_v1  ;;  %p444_p12 = pnand %p443_p11, %p437_p8 }
  0x1c   :  { %v261_v44 = vld [vmem:[#allocation3] sm:$0xff] }
  0xec   :  { %v187_v10 = vpop.f32.mrb[0].mxu1 }
  0xed   :  { %192 = vrot.lane.b32.xlu0 %v187_v10, %s467_s1  ;;  %v388_v11 = vpop.f32.mrb[1].mxu1  ;;  %390 = vmatpush3.msra.mxu0 %v187_v10  ;;  %v104_v12 = vpop.f32.mrb[0].mxu0 }
  0xee   :  { %109 = vst.msk [vmem:[#allocation2] sm:$0xff] %vm108_vm2, %v104_v12  ;;  %v381_v13 = vpop.f32.mrb[1].mxu0 }
  0xf5   :  { %v227_v14 = vld [vmem:[#allocation2] sm:$0xff] }
  0xf6   :  { %230 = vperm.xlu0 %407, %v227_v14  }
 0x15f   :  { %v193_v15 = vpop.permute.xlu0 %192 }
 0x160   :  { %195 = vxpose.xlu1.b32.start.end [1/1] (short) (narrow) %v193_v15, 8 }
 0x175   :  { %v231_v20 = vpop.permute.xlu0 %230 }
 0x1e0   :  { %v211_v19 = vpop.trf.xlu1 }
 0x1e1   :  { %v236_v21 = vrot.slane %v211_v19, %v235_v18 }
 0x1e3   :  { %v237_v22 = vadd.f32 %v236_v21, %v231_v20 }
 0x1e5   :  { %vm238_vm4 = vcmp.gt.f32.partialorder %v237_v22, 0.0  ;;  %v239_v23 = vmul.f32 0.2, %v237_v22 }
 0x1e7   :  { %v240_v24 = vsel %vm238_vm4, %v237_v22, %v239_v23 }
 0x1e8   :  { %v242_v25 = vsel %vm241_vm5, %v240_v24, -inf }
 0x1e9   :  { %v243_v26 = vrot.slane %v242_v25, 4 }
 0x1eb   :  { %v244_v27 = vmax.f32 %v242_v25, %v243_v26 }
 0x1ed   :  { %v245_v28 = vrot.slane %v244_v27, 2 }
 0x1ef   :  { %v246_v29 = vmax.f32 %v244_v27, %v245_v28 }
 0x1f1   :  { %v247_v30 = vrot.slane %v246_v29, 1 }
 0x1f3   :  { %v248_v31 = vmax.f32 %v246_v29, %v247_v30 }
 0x1f5   :  { %v249_v32 = vsub.f32 %v240_v24, %v248_v31 }
 0x1f7   :  { %v250_v33 = vmul.f32 1.442695, %v249_v32 }
 0x1f9   :  { %408 = vpow2.f32 %v250_v33 }
 0x203   :  { %v409_v34 = vpop.eup %408 }
 0x204   :  { %v252_v35 = vsel %vm241_vm5, %v409_v34, 0.0 }
 0x205   :  { %v253_v36 = vrot.slane %v252_v35, 4 }
 0x207   :  { %v254_v37 = vadd.f32 %v253_v36, %v252_v35 }
 0x209   :  { %v255_v38 = vrot.slane %v254_v37, 2 }
 0x20b   :  { %v256_v39 = vadd.f32 %v255_v38, %v254_v37 }
 0x20d   :  { %v257_v40 = vrot.slane %v256_v39, 1 }
 0x20f   :  { %v258_v41 = vadd.f32 %v257_v40, %v256_v39 }
 0x211   :  { %410 = vrcp.f32 %v258_v41 }
 0x21b   :  { %v411_v42 = vpop.eup %410 }
 0x21c   :  { %v260_v43 = vmul.f32 %v411_v42, %v409_v34 }
 0x21e   :  { %392 = vmatmul.mubr.msk.f32.vlgmr.msra.gmra.mrb[2].mxu0 %vm241_vm5, %v260_v43 }
 0x2f1   :  { %v331_v45 = vpop.f32.mrb[2].mxu0 }
 0x2f2   :  { %v335_v46 = vadd.f32 %v331_v45, %v261_v44  ;;  %v393_v47 = vpop.f32.mrb[3].mxu0 }
 0x2f4   :  { %337 = vst.msk [vmem:[#allocation3] sm:$0xff] %vm110_vm3, %v335_v46 }
 0x2fb   :  { %v341_v48 = vld [vmem:[#allocation3] sm:$0xff] }
 0x2fc   :  { %v343_v49 = vmul.f32 1.442695, %v341_v48  ;;  %vm342_vm6 = vcmp.gt.f32.partialorder %v341_v48, 0.0 }
 0x2fe   :  { %412 = vpow2.f32 %v343_v49 }
 0x308   :  { %v413_v50 = vpop.eup %412 }
 0x309   :  { %v366_v51 = vadd.f32 -1.0, %v413_v50 }
 0x30b   :  { %v346_v52 = vsel %vm342_vm6, %v341_v48, %v366_v51 }
 0x30c   :  { %347 = vst.msk [vmem:[#allocation7] sm:$0xff] %vm110_vm3, %v346_v52 }
 0x30d   :  { %447 = shalt.err (!%p444_p12)
}
 0x30e   :  { %s448_s8 = scalar_lea.hbm %s537_s3, 128 }
 0x30f   :  { %p449_p13 = scmp.ne.s32.totalorder %s537_s3, %s448_s8  ;;  %p452_p0 = scmp.lt.u32.totalorder %s448_s8, %s537_s3 }
 0x311   :  { %p454_p1 = pnand %p452_p0, %p449_p13 }
 0x313   :  { %457 = shalt.err (!%p454_p1)
}
 0x314   :  { %357 = dma.vmem_to_hbm [thread:$0]  %s355_s4, 128, %s537_s3, [#allocation6]  }
 0x315   :  { %460 = dma.done.wait [#allocation6], 128  }
 0x316   :  { %461 = vsyncadd [#allocation6], 4294967168 }
 0x317   :  { %361 = vsyncpa [#allocation5], 1 }
 0x318   :  { %362 = vsyncpa [#allocation6], 1 }

</bundles_post_ra>
